<compile_context>
chip_gen: v5e
topology: v5e:2x2
jax: 0.10.0
libtpu: 0.0.40
codegen_flags: <defaults>
</compile_context>

<pallas_src>
import functools

import jax
import jax.numpy as jnp
from jax import lax
from jax.experimental import pallas as pl
from jax.experimental.pallas import tpu as pltpu


# ----------------------------- planning helpers -------------------------------

def _round_up(x, n):
    return ((x + n - 1) // n) * n


def _vmem_limit_bytes():
    """Generation-aware scoped-VMEM request (v5e/v6e: 128 MiB phys, v7x: 64 MiB)."""
    try:
        cap = int(pltpu.get_tpu_info().vmem_capacity_bytes)
    except Exception:
        cap = 64 * 1024 * 1024                      # conservative (covers v7x)
    return max(32 * 1024 * 1024, min((cap * 3) // 4, 100 * 1024 * 1024))


def _k_tiling(k, tk_cap):
    """K padded to lane granularity (128) only.  tk is a multiple of 128 (or the
    whole 128-padded K when it fits one block); waste is < 128 cols per step."""
    k128 = _round_up(k, 128)
    tk_cap = max(128, tk_cap)
    if k128 <= tk_cap:
        return k128, k128, 1
    n_k = -(-k128 // tk_cap)
    tk = _round_up(-(-k128 // n_k), 128)
    return n_k * tk, tk, n_k


def _plan(m, k, itemsize, vmem_limit, force_row_blocked=False):
    """Choose the tiling strategy and tile sizes from an explicit VMEM budget."""
    budget = int(vmem_limit * 0.6)        # headroom for compiler scratch/metadata
    sublane = {1: 32, 2: 16}.get(itemsize, 8)
    m_sub = _round_up(m, sublane)                         # layout rows of streamed F
    gram_tile = _round_up(m, 8) * _round_up(m, 128) * 4   # (m, m) f32 tile in VMEM

    # Path A: full gram resident in VMEM, F streamed from HBM exactly once.
    fixed_a = 5 * gram_tile       # resident out / acc / target incl. double buffers
    if (not force_row_blocked) and fixed_a + 2 * m_sub * 128 * itemsize <= budget:
        tk_cap = (budget - fixed_a) // (2 * m_sub * itemsize)
        tk_cap = min(max(128, (tk_cap // 128) * 128), 8192)
        k_pad, tk, n_k = _k_tiling(k, tk_cap)
        return {"mode": "full", "k_pad": k_pad, "tk": tk, "n_k": n_k}

    # Path B: row-blocked fallback for very large M (gram does not fit VMEM).
    m_pad = _round_up(m, 128)
    tm = 256 if m_pad % 256 == 0 else 128
    fixed_b = 5 * tm * m_pad * 4
    tk_cap = (budget - fixed_b) // max(1, 2 * m_pad * itemsize)
    tk_cap = min(max(256, (tk_cap // 128) * 128), 8192)
    k_pad, tk, n_k = _k_tiling(k, tk_cap)
    return {"mode": "rows", "m_pad": m_pad, "tm": tm,
            "k_pad": k_pad, "tk": tk, "n_k": n_k}


def _pad2d(x, rows, cols):
    r, c = x.shape
    if r == rows and c == cols:
        return x
    return jnp.pad(x, ((0, rows - r), (0, cols - c)))


# ----------------------------- kernels: Path A (full gram in VMEM) ------------

def _gram_full_kernel(f_ref, g_ref, *, inv_scale):
    """Resident G += F_k @ F_k^T over the 1-D K grid; scale once at the end."""
    kk = pl.program_id(0)

    @pl.when(kk == 0)
    def _():
        g_ref[...] = jnp.zeros_like(g_ref)

    # NT contraction (last axis of both operands): no transposed copy, f32 acc.
    g_ref[...] += lax.dot_general(
        f_ref[...], f_ref[...],
        dimension_numbers=(((1,), (1,)), ((), ())),
        preferred_element_type=jnp.float32)

    @pl.when(kk == pl.num_programs(0) - 1)
    def _():
        g_ref[...] *= inv_scale


def _style_loss_full_kernel(f_ref, t_ref, loss_ref, acc_ref, *, inv_scale, inv_mm):
    """Fused: accumulate the gram in VMEM, reduce mse against the target once."""
    kk = pl.program_id(0)

    @pl.when(kk == 0)
    def _():
        acc_ref[...] = jnp.zeros_like(acc_ref)

    acc_ref[...] += lax.dot_general(
        f_ref[...], f_ref[...],
        dimension_numbers=(((1,), (1,)), ((), ())),
        preferred_element_type=jnp.float32)

    @pl.when(kk == pl.num_programs(0) - 1)
    def _():
        diff = acc_ref[...] * inv_scale - t_ref[...]
        loss_ref[0, 0] = jnp.sum(diff * diff) * inv_mm


# ----------------------------- kernels: Path B (row-blocked fallback) ---------

def _gram_rows_kernel(f_ref, g_ref, *, tm, inv_scale):
    """G[i-block, :] accumulated directly in the resident output block; the LHS
    row block is sliced out of the single full-rows F buffer (no dup input)."""
    kk = pl.program_id(1)

    @pl.when(kk == 0)
    def _():
        g_ref[...] = jnp.zeros_like(g_ref)

    row0 = pl.multiple_of(pl.program_id(0) * tm, tm)
    g_ref[...] += lax.dot_general(
        f_ref[pl.ds(row0, tm), :], f_ref[...],
        dimension_numbers=(((1,), (1,)), ((), ())),
        preferred_element_type=jnp.float32)

    @pl.when(kk == pl.num_programs(1) - 1)
    def _():
        g_ref[...] *= inv_scale


def _style_loss_rows_kernel(f_ref, t_ref, part_ref, acc_ref, *, tm, inv_scale):
    """Per-row-block partial sum of squared diffs -> lane-dense (8,128) output
    block, so the row grid axis can be 'parallel' (v7x megacore) race-free."""
    kk = pl.program_id(1)

    @pl.when(kk == 0)
    def _():
        acc_ref[...] = jnp.zeros_like(acc_ref)

    row0 = pl.multiple_of(pl.program_id(0) * tm, tm)
    acc_ref[...] += lax.dot_general(
        f_ref[pl.ds(row0, tm), :], f_ref[...],
        dimension_numbers=(((1,), (1,)), ((), ())),
        preferred_element_type=jnp.float32)

    @pl.when(kk == pl.num_programs(1) - 1)
    def _():
        diff = acc_ref[...] * inv_scale - t_ref[...]
        s = jnp.sum(diff * diff)
        rows = lax.broadcasted_iota(jnp.int32, (8, 128), 0)
        cols = lax.broadcasted_iota(jnp.int32, (8, 128), 1)
        part_ref[...] = jnp.where((rows == 0) & (cols == 0), s, jnp.float32(0.0))


# ----------------------------- wrappers ----------------------------------------

def gram_matrix(x, *, force_row_blocked=False):
    """x: (N, C, H, W) -> G = F @ F.T / (N*C*H*W), F = x.view(N*C, H*W).  f32."""
    n, c, h, w = x.shape
    m, k = n * c, h * w
    feats = x.reshape(m, k)
    itemsize = feats.dtype.itemsize
    vmem_limit = _vmem_limit_bytes()
    plan = _plan(m, k, itemsize, vmem_limit, force_row_blocked)
    inv_scale = 1.0 / float(m * k)
    k_pad, tk, n_k = plan["k_pad"], plan["tk"], plan["n_k"]

    if plan["mode"] == "full":
        feats = _pad2d(feats, m, k_pad)            # K -> 128 multiple only
        return pl.pallas_call(
            functools.partial(_gram_full_kernel, inv_scale=inv_scale),
            out_shape=jax.ShapeDtypeStruct((m, m), jnp.float32),
            grid_spec=pltpu.PrefetchScalarGridSpec(
                num_scalar_prefetch=0,
                grid=(n_k,),
                in_specs=[pl.BlockSpec((m, tk), lambda kk: (0, kk))],
                out_specs=pl.BlockSpec((m, m), lambda kk: (0, 0)),
            ),
            compiler_params=pltpu.CompilerParams(
                dimension_semantics=("arbitrary",),
                vmem_limit_bytes=vmem_limit),
            cost_estimate=pl.CostEstimate(
                flops=2 * m * m * k_pad,
                bytes_accessed=m * k_pad * itemsize + m * m * 4,
                transcendentals=0),
        )(feats)

    # Row-blocked fallback (very large M).
    m_pad, tm = plan["m_pad"], plan["tm"]
    n_rows = m_pad // tm
    feats = _pad2d(feats, m_pad, k_pad)
    g_pad = pl.pallas_call(
        functools.partial(_gram_rows_kernel, tm=tm, inv_scale=inv_scale),
        out_shape=jax.ShapeDtypeStruct((m_pad, m_pad), jnp.float32),
        grid_spec=pltpu.PrefetchScalarGridSpec(
            num_scalar_prefetch=0,
            grid=(n_rows, n_k),
            in_specs=[pl.BlockSpec((m_pad, tk), lambda i, kk: (0, kk))],
            out_specs=pl.BlockSpec((tm, m_pad), lambda i, kk: (i, 0)),
        ),
        compiler_params=pltpu.CompilerParams(
            dimension_semantics=("parallel", "arbitrary"),
            vmem_limit_bytes=vmem_limit),
        cost_estimate=pl.CostEstimate(
            flops=2 * m_pad * m_pad * k_pad,
            bytes_accessed=n_rows * m_pad * k_pad * itemsize + m_pad * m_pad * 4,
            transcendentals=0),
    )(feats)
    return g_pad[:m, :m]


def style_loss_forward(x, target_gram, *, force_row_blocked=False):
    """Returns (x passthrough, scalar mse loss between gram(x) and target_gram)."""
    n, c, h, w = x.shape
    m, k = n * c, h * w
    feats = x.reshape(m, k)
    itemsize = feats.dtype.itemsize
    vmem_limit = _vmem_limit_bytes()
    plan = _plan(m, k, itemsize, vmem_limit, force_row_blocked)
    inv_scale = 1.0 / float(m * k)
    inv_mm = 1.0 / float(m * m)
    k_pad, tk, n_k = plan["k_pad"], plan["tk"], plan["n_k"]
    tgt = target_gram.astype(jnp.float32)

    if plan["mode"] == "full":
        feats = _pad2d(feats, m, k_pad)
        loss = pl.pallas_call(
            functools.partial(_style_loss_full_kernel,
                              inv_scale=inv_scale, inv_mm=inv_mm),
            out_shape=jax.ShapeDtypeStruct((1, 1), jnp.float32),
            grid_spec=pltpu.PrefetchScalarGridSpec(
                num_scalar_prefetch=0,
                grid=(n_k,),
                in_specs=[
                    pl.BlockSpec((m, tk), lambda kk: (0, kk)),   # F K-slice
                    pl.BlockSpec((m, m), lambda kk: (0, 0)),     # resident target
                ],
                out_specs=pl.BlockSpec(memory_space=pltpu.SMEM),
                scratch_shapes=[pltpu.VMEM((m, m), jnp.float32)],
            ),
            compiler_params=pltpu.CompilerParams(
                dimension_semantics=("arbitrary",),
                vmem_limit_bytes=vmem_limit),
            cost_estimate=pl.CostEstimate(
                flops=2 * m * m * k_pad + 3 * m * m,
                bytes_accessed=m * k_pad * itemsize + m * m * 4 + 4,
                transcendentals=0),
        )(feats, tgt)
        return x, loss[0, 0]

    # Row-blocked fallback with per-row-block partial sums (parallel row axis).
    m_pad, tm = plan["m_pad"], plan["tm"]
    n_rows = m_pad // tm
    feats = _pad2d(feats, m_pad, k_pad)
    tgt = _pad2d(tgt, m_pad, m_pad)
    partials = pl.pallas_call(
        functools.partial(_style_loss_rows_kernel, tm=tm, inv_scale=inv_scale),
        out_shape=jax.ShapeDtypeStruct((n_rows * 8, 128), jnp.float32),
        grid_spec=pltpu.PrefetchScalarGridSpec(
            num_scalar_prefetch=0,
            grid=(n_rows, n_k),
            in_specs=[
                pl.BlockSpec((m_pad, tk), lambda i, kk: (0, kk)),   # all F rows
                pl.BlockSpec((tm, m_pad), lambda i, kk: (i, 0)),    # target rows
            ],
            out_specs=pl.BlockSpec((8, 128), lambda i, kk: (i, 0)),
            scratch_shapes=[pltpu.VMEM((tm, m_pad), jnp.float32)],
        ),
        compiler_params=pltpu.CompilerParams(
            dimension_semantics=("parallel", "arbitrary"),
            vmem_limit_bytes=vmem_limit),
        cost_estimate=pl.CostEstimate(
            flops=2 * m_pad * m_pad * k_pad + 3 * m_pad * m_pad,
            bytes_accessed=(n_rows * m_pad * k_pad * itemsize
                            + m_pad * m_pad * 4 + n_rows * 8 * 128 * 4),
            transcendentals=0),
    )(feats, tgt)
    loss = jnp.sum(partials) * inv_mm       # only the [8*i, 0] entries are nonzero
    return x, loss


class StyleLoss:
    """Mirror of the PyTorch StyleLoss module: forward is a passthrough that
    records self.loss = mse_loss(gram(input), gram(target_feature))."""

    def __init__(self, target_feature, *, force_row_blocked=False):
        self._force = force_row_blocked
        self.target = gram_matrix(target_feature,
                                  force_row_blocked=force_row_blocked)  # constant
        self.loss = None

    def __call__(self, x):
        out, loss = style_loss_forward(x, self.target,
                                       force_row_blocked=self._force)
        self.loss = loss
        return out


# ----------------------------- demo / check ------------------------------------

def _ref_gram(x):
    n, c, h, w = x.shape
    f = x.reshape(n * c, h * w).astype(jnp.float32)
    return (f @ f.T) / (n * c * h * w)


def _check(x, target_feature, *, force_row_blocked=False, tag=""):
    module = StyleLoss(target_feature, force_row_blocked=force_row_blocked)
    out = jax.block_until_ready(module(x))
    loss = jax.block_until_ready(module.loss)

    g = gram_matrix(x, force_row_blocked=force_row_blocked)
    g_ref = _ref_gram(x)
    loss_ref = jnp.mean((g_ref - _ref_gram(target_feature)) ** 2)

    assert out.shape == x.shape and jnp.allclose(out, x), f"{tag}: not a passthrough"
    assert jnp.allclose(g, g_ref, rtol=1e-4, atol=1e-5), f"{tag}: gram mismatch"
    assert jnp.allclose(loss, loss_ref, rtol=1e-4, atol=1e-6), (tag, loss, loss_ref)


if __name__ == "__main__":
    key = jax.random.PRNGKey(0)
    keys = jax.random.split(key, 8)

    # Primary small shapes consistent with the module: NCHW = (2, 4, 16, 16).
    _check(jax.random.normal(keys[0], (2, 4, 16, 16), dtype=jnp.float32),
           jax.random.normal(keys[1], (2, 4, 16, 16), dtype=jnp.float32),
           tag="full/basic")

    # K = H*W not a multiple of 128 -> exercises the lane-only zero-pad path.
    _check(jax.random.normal(keys[2], (1, 8, 14, 14), dtype=jnp.float32),
           jax.random.normal(keys[3], (1, 8, 14, 14), dtype=jnp.float32),
           tag="full/ragged-K")

    # K large enough to be tiled over multiple K grid steps (n_k > 1).
    _check(jax.random.normal(keys[4], (1, 8, 96, 96), dtype=jnp.float32),
           jax.random.normal(keys[5], (1, 8, 96, 96), dtype=jnp.float32),
           tag="full/tiled-K")

    # Row-blocked fallback path (forced), multiple row blocks.
    _check(jax.random.normal(keys[6], (2, 160, 8, 8), dtype=jnp.float32),
           jax.random.normal(keys[7], (2, 160, 8, 8), dtype=jnp.float32),
           force_row_blocked=True, tag="rows/forced")

    print("KERNEL_OK")
</pallas_src>

<mosaic_0001>
module attributes {stable_mosaic.version = 11 : i64} {
  func.func @_gram_full_kernel(%arg0: i32, %arg1: memref<8x256xf32, #tpu.memory_space<vmem>>, %arg2: memref<8x8xf32, #tpu.memory_space<vmem>>) attributes {dimension_semantics = [#tpu.dimension_semantics<arbitrary>], iteration_bounds = array<i64: 1>, scalar_prefetch = 0 : i64, scratch_operands = 0 : i64, tpu.core_type = #tpu.core_type<tc>, window_params = [{transform_indices = @transform_0, window_bounds = array<i64: 8, 256>}, {pipeline_mode = #tpu.pipeline_mode<synchronous>, transform_indices = @transform_1, window_bounds = array<i64: 8, 8>}]} {
    %c0_i32 = arith.constant 0 : i32
    %0 = arith.cmpi eq, %arg0, %c0_i32 : i32
    %1 = arith.extui %0 : i1 to i32
    %c0_i32_0 = arith.constant 0 : i32
    %2 = arith.cmpi ne, %1, %c0_i32_0 : i32
    scf.if %2 {
      %cst_10 = arith.constant 0.000000e+00 : f32
      %12 = vector.broadcast %cst_10 : f32 to vector<8x8xf32>
      %c0_11 = arith.constant 0 : index
      %c0_12 = arith.constant 0 : index
      %13 = vector.load %arg2[%c0_11, %c0_12] : memref<8x8xf32, #tpu.memory_space<vmem>>, vector<8x8xf32>
      tpu.vector_store %arg2[%c0_11, %c0_12], %12 {strides = array<i32>} : memref<8x8xf32, #tpu.memory_space<vmem>>, vector<8x8xf32>,
    } else {
    }
    %c0 = arith.constant 0 : index
    %c0_1 = arith.constant 0 : index
    %3 = vector.load %arg2[%c0, %c0_1] : memref<8x8xf32, #tpu.memory_space<vmem>>, vector<8x8xf32>
    %c0_2 = arith.constant 0 : index
    %c0_3 = arith.constant 0 : index
    %4 = vector.load %arg1[%c0_2, %c0_3] : memref<8x256xf32, #tpu.memory_space<vmem>>, vector<8x256xf32>
    %c0_4 = arith.constant 0 : index
    %c0_5 = arith.constant 0 : index
    %5 = vector.load %arg1[%c0_4, %c0_5] : memref<8x256xf32, #tpu.memory_space<vmem>>, vector<8x256xf32>
    %cst = arith.constant dense<0.000000e+00> : vector<8x8xf32>
    %6 = tpu.matmul %4, %5, %cst {dimension_numbers = #tpu.dot_dimension_numbers<[1], [1], [0], [0], [0, 0, 1, 0], [], []>} : vector<8x256xf32>, vector<8x256xf32>, vector<8x8xf32> -> vector<8x8xf32>
    %7 = arith.addf %3, %6 : vector<8x8xf32>
    %c0_6 = arith.constant 0 : index
    %c0_7 = arith.constant 0 : index
    %8 = vector.load %arg2[%c0_6, %c0_7] : memref<8x8xf32, #tpu.memory_space<vmem>>, vector<8x8xf32>
    tpu.vector_store %arg2[%c0_6, %c0_7], %7 {strides = array<i32>} : memref<8x8xf32, #tpu.memory_space<vmem>>, vector<8x8xf32>,
    %c0_i32_8 = arith.constant 0 : i32
    %9 = arith.cmpi eq, %arg0, %c0_i32_8 : i32
    %10 = arith.extui %9 : i1 to i32
    %c0_i32_9 = arith.constant 0 : i32
    %11 = arith.cmpi ne, %10, %c0_i32_9 : i32
    scf.if %11 {
      %c0_10 = arith.constant 0 : index
      %c0_11 = arith.constant 0 : index
      %12 = vector.load %arg2[%c0_10, %c0_11] : memref<8x8xf32, #tpu.memory_space<vmem>>, vector<8x8xf32>
      %cst_12 = arith.constant 4.8828125E-4 : f32
      %13 = vector.broadcast %cst_12 : f32 to vector<8x8xf32>
      %14 = arith.mulf %12, %13 : vector<8x8xf32>
      %c0_13 = arith.constant 0 : index
      %c0_14 = arith.constant 0 : index
      %15 = vector.load %arg2[%c0_13, %c0_14] : memref<8x8xf32, #tpu.memory_space<vmem>>, vector<8x8xf32>
      tpu.vector_store %arg2[%c0_13, %c0_14], %14 {strides = array<i32>} : memref<8x8xf32, #tpu.memory_space<vmem>>, vector<8x8xf32>,
    } else {
    }
    return
  }
  func.func @transform_0(%arg0: i32) -> (i32, i32) {
    %c0_i32 = arith.constant 0 : i32
    %c0_i32_0 = arith.constant 0 : i32
    return %c0_i32, %arg0 : i32, i32
  }
  func.func @transform_1(%arg0: i32) -> (i32, i32) {
    %c0_i32 = arith.constant 0 : i32
    %c0_i32_0 = arith.constant 0 : i32
    %c0_i32_1 = arith.constant 0 : i32
    return %c0_i32, %c0_i32_0 : i32, i32
  }
}

</mosaic_0001>

<bundles_post_ra>
// kernel: tpu_custom_call.1
= control target key start
LH: loop header
LB: loop body
LE: loop exit
PB: predicated region body
PF: predicated region fallthrough
CT: control target
= control target key end

     0   :  { %6 = vsyncpa [#allocation3], 0  ;;  %s175_s0 = inlined_call_operand.hbm [shape: f32[8,256], index: 0, kind: input, shape index: {}]   ;;  %s176_s1 = inlined_call_operand.hbm [shape: f32[8,8], index: 1, kind: output, shape index: {}]  }
   0x1   :  { %7 = vsyncpa [#allocation4], 0  ;;  %s13_s8 = sshll.u32 %s175_s0, 4  ;;  %s153_s9 = smov [#allocation2]   ;;  %s14_s8 = int_to_ptr.hbm [resolvable:$true] %s13_s8 }
   0x2   :  { %s15_s10 = sshll.u32 %s153_s9, 4  ;;  %s16_s10 = int_to_ptr.vmem [resolvable:$true] %s15_s10 }
   0x3   :  { %18 = dma.hbm_to_vmem [thread:$0]  %s14_s8, 256, %s16_s10, [#allocation3]  }
   0x4   :  { %149 = dma.done.wait [#allocation3], 256  }
   0x5   :  { %150 = vsyncadd [#allocation3], 4294967040  ;;  %v30_v0 = vld [vmem:[#allocation2] sm:$0xff]  ;;  %v31_v1 = vld [vmem:[#allocation2 + $0x8] sm:$0xff]  ;;  %vm27_vm0 = vcmask 64512   ;;  %v154_v2 = vmov 0.0  }
   0x6   :  { %47 = vmatpush.xpose.msra.mxu0 %v30_v0  ;;  %67 = vmatpush.xpose.msra.mxu1 %v31_v1  ;;  %28 = vst.msk [vmem:[#allocation5] sm:$0xff] %vm27_vm0, %v154_v2  ;;  %s155_s0 = smov [#allocation5]   ;;  %s88_s14 = sshll.u32 %s176_s1, 4  ;;  %s89_s14 = int_to_ptr.hbm [resolvable:$true] %s88_s14 }
   0x7   :  { %s86_s11 = sshll.u32 %s155_s0, 4  ;;  %s87_s11 = int_to_ptr.vmem [resolvable:$true] %s86_s11 }
   0x9   :  { %48 = vmatmul.f32.vlgmr.msra.gmra.mxu0 %v30_v0  ;;  %68 = vmatmul.f32.vlgmr.msra.gmra.mxu1 %v31_v1 }
   0xd   :  { %v29_v4 = vld [vmem:[#allocation5] sm:$0xff] }
  0x86   :  { %v49_v3 = vpop.f32.mrf.mxu0  ;;  %v69_v5 = vpop.f32.mrf.mxu1 }
  0x87   :  { %v70_v6 = vadd.f32 %v69_v5, %v49_v3 }
  0x89   :  { %v72_v7 = vadd.f32 %v70_v6, %v29_v4 }
  0x8b   :  { %74 = vst.msk [vmem:[#allocation5] sm:$0xff] %vm27_vm0, %v72_v7 }
  0x92   :  { %v78_v8 = vld [vmem:[#allocation5] sm:$0xff] }
  0x93   :  { %v79_v9 = vmul.f32 0.00048828125, %v78_v8 }
  0x95   :  { %80 = vst.msk [vmem:[#allocation5] sm:$0xff] %vm27_vm0, %v79_v9 }
  0x96   :  { %91 = dma.vmem_to_hbm [thread:$0]  %s87_s11, 128, %s89_s14, [#allocation4]  }
  0x97   :  { %151 = dma.done.wait [#allocation4], 128  }
  0x98   :  { %152 = vsyncadd [#allocation4], 4294967168 }
  0x99   :  { %96 = vsyncpa [#allocation3], 1 }
  0x9a   :  { %97 = vsyncpa [#allocation4], 1 }

</bundles_post_ra>
